<compile_context>
chip_gen: v7x
topology: tpu7x:2x2x1
jax: 0.10.0
libtpu: 0.0.40
codegen_flags: <defaults>
</compile_context>

<pallas_src>
from functools import partial

import jax
import jax.numpy as jnp
from jax.experimental import pallas as pl
from jax.experimental.pallas import tpu as pltpu


def _noise_trigger_kernel(img_ref, noise_ref, tags_ref, out_ref):
    # img_ref  : VMEM f32[TB, F]   (TB batch rows, F = C*H*W, lane-dense)
    # noise_ref: VMEM f32[1,  F]   (same block every step -> resident in VMEM)
    # tags_ref : VMEM i32[TB, 1]
    # out_ref  : VMEM f32[TB, F]   (aliased with the image HBM buffer)
    img = img_ref[...]
    noisy = jnp.clip(img + noise_ref[...], 0.0, 1.0)          # (1,F) broadcasts over rows
    out_ref[...] = jnp.where(tags_ref[...] != 0, noisy, img)  # (TB,1) row mask select


def _round_up(x, m):
    return ((x + m - 1) // m) * m


def _choose_block_rows(n, block_rows):
    """Pick a batch tile size (static, from shapes only)."""
    if n <= 8:
        # Tiny batch: one tile equal to the full batch dim (sublane-masked
        # stores, benign).  Not worth splitting across cores.
        return n
    # At least two batch tiles so the "parallel" grid axis can shard across the
    # two TensorCores on v7x (no-op on single-TC v5e/v6e), capped at block_rows.
    return min(block_rows, _round_up(pl.cdiv(n, 2), 8))


@partial(jax.jit, static_argnames=("block_rows",), donate_argnums=(0,))
def noise_trigger(image, noise, backdoor_tags, *, block_rows=1024):
    """image: f32[N, C, H, W] (donated); noise: f32[C, H, W]; backdoor_tags: int[N]."""
    N, C, H, W = image.shape
    assert noise.shape == (C, H, W)
    assert block_rows % 8 == 0
    F = C * H * W  # 3*16*16 = 768 = 6*128 -> fully lane-dense, unmasked vst

    # Free metadata reshapes (contiguous NCHW), done once in the wrapper.
    img2d = image.reshape(N, F)
    noise2d = noise.reshape(1, F)
    tags2d = backdoor_tags.astype(jnp.int32).reshape(N, 1)

    tb = _choose_block_rows(N, block_rows)
    grid = (pl.cdiv(N, tb),)  # ragged last block handled by Pallas masking

    out2d = pl.pallas_call(
        _noise_trigger_kernel,
        out_shape=jax.ShapeDtypeStruct((N, F), image.dtype),
        grid=grid,
        in_specs=[
            pl.BlockSpec((tb, F), lambda i: (i, 0)),   # image tile
            pl.BlockSpec((1, F), lambda i: (0, 0)),    # noise, re-used every step
            pl.BlockSpec((tb, 1), lambda i: (i, 0)),   # per-row tags
        ],
        out_specs=pl.BlockSpec((tb, F), lambda i: (i, 0)),
        input_output_aliases={0: 0},  # + donate_argnums above => truly in-place
        compiler_params=pltpu.CompilerParams(
            dimension_semantics=("parallel",),
            vmem_limit_bytes=32 * 1024 * 1024,  # room for 1024-row double-buffered tiles
        ),
    )(img2d, noise2d, tags2d)

    return out2d.reshape(N, C, H, W)


def noise_trigger_ref(image, noise, backdoor_tags):
    noisy = jnp.clip(image + noise[None], 0.0, 1.0)
    sel = (backdoor_tags != 0)[:, None, None, None]
    return jnp.where(sel, noisy, image)


if __name__ == "__main__":
    key = jax.random.PRNGKey(0)
    k_img, k_noise, k_img2, k_tag2 = jax.random.split(key, 4)

    # cfg.INPUT.SIZE = (16, 16), 3 channels (matches torch.rand([3] + INPUT.SIZE)).
    N, C, H, W = 2, 3, 16, 16
    noise = jax.random.uniform(k_noise, (C, H, W), dtype=jnp.float32)
    image = jax.random.uniform(k_img, (N, C, H, W), dtype=jnp.float32)
    backdoor_tags = jnp.array([1, 0], dtype=jnp.int32)  # first image poisoned

    ref = noise_trigger_ref(image, noise, backdoor_tags)  # compute before donation
    out = noise_trigger(image, noise, backdoor_tags)
    out = jax.block_until_ready(out)
    assert jnp.allclose(out, ref, atol=1e-6), "mismatch vs reference (small batch)"

    # Multi-tile path with a ragged last block (no padding, no post-slice).
    N2 = 20
    image2 = jax.random.uniform(k_img2, (N2, C, H, W), dtype=jnp.float32)
    tags2 = (jax.random.uniform(k_tag2, (N2,)) > 0.5).astype(jnp.int32)
    ref2 = noise_trigger_ref(image2, noise, tags2)  # compute before donation
    out2 = noise_trigger(image2, noise, tags2, block_rows=8)
    out2 = jax.block_until_ready(out2)
    assert jnp.allclose(out2, ref2, atol=1e-6), "mismatch vs reference (tiled/ragged batch)"

    print("KERNEL_OK")
</pallas_src>

<mosaic_0001>
module attributes {stable_mosaic.version = 11 : i64} {
  func.func @_noise_trigger_kernel(%arg0: i32, %arg1: memref<2x768xf32, #tpu.memory_space<vmem>>, %arg2: memref<1x768xf32, #tpu.memory_space<vmem>>, %arg3: memref<2x1xi32, #tpu.memory_space<vmem>>, %arg4: memref<2x768xf32, #tpu.memory_space<vmem>>) attributes {dimension_semantics = [#tpu.dimension_semantics<parallel>], iteration_bounds = array<i64: 1>, scalar_prefetch = 0 : i64, scratch_operands = 0 : i64, tpu.core_type = #tpu.core_type<tc>, window_params = [{transform_indices = @transform_0, window_bounds = array<i64: 2, 768>}, {pipeline_mode = #tpu.pipeline_mode<synchronous>, transform_indices = @transform_1, window_bounds = array<i64: 1, 768>}, {transform_indices = @transform_2, window_bounds = array<i64: 2, 1>}, {transform_indices = @transform_3, window_bounds = array<i64: 2, 768>}]} {
    %c0 = arith.constant 0 : index
    %c0_0 = arith.constant 0 : index
    %0 = vector.load %arg1[%c0, %c0_0] : memref<2x768xf32, #tpu.memory_space<vmem>>, vector<2x768xf32>
    %c0_1 = arith.constant 0 : index
    %c0_2 = arith.constant 0 : index
    %1 = vector.load %arg2[%c0_1, %c0_2] : memref<1x768xf32, #tpu.memory_space<vmem>>, vector<1x768xf32>
    %2 = vector.broadcast %1 : vector<1x768xf32> to vector<2x768xf32>
    %3 = arith.addf %0, %2 : vector<2x768xf32>
    %cst = arith.constant 0.000000e+00 : f32
    %cst_3 = arith.constant 1.000000e+00 : f32
    %4 = vector.broadcast %cst : f32 to vector<2x768xf32>
    %5 = arith.maximumf %4, %3 : vector<2x768xf32>
    %6 = vector.broadcast %cst_3 : f32 to vector<2x768xf32>
    %7 = arith.minimumf %6, %5 : vector<2x768xf32>
    %c0_4 = arith.constant 0 : index
    %c0_5 = arith.constant 0 : index
    %8 = vector.load %arg3[%c0_4, %c0_5] : memref<2x1xi32, #tpu.memory_space<vmem>>, vector<2x1xi32>
    %c0_i32 = arith.constant 0 : i32
    %9 = vector.broadcast %c0_i32 : i32 to vector<2x1xi32>
    %10 = arith.cmpi ne, %8, %9 : vector<2x1xi32>
    %11 = vector.shape_cast %10 : vector<2x1xi1> to vector<2x1xi1>
    %12 = vector.broadcast %11 : vector<2x1xi1> to vector<2x768xi1>
    %13 = arith.select %12, %7, %0 : vector<2x768xi1>, vector<2x768xf32>
    %c0_6 = arith.constant 0 : index
    %c0_7 = arith.constant 0 : index
    %14 = vector.load %arg4[%c0_6, %c0_7] : memref<2x768xf32, #tpu.memory_space<vmem>>, vector<2x768xf32>
    tpu.vector_store %arg4[%c0_6, %c0_7], %13 {strides = array<i32>} : memref<2x768xf32, #tpu.memory_space<vmem>>, vector<2x768xf32>,
    return
  }
  func.func @transform_0(%arg0: i32) -> (i32, i32) {
    %c0_i32 = arith.constant 0 : i32
    %c0_i32_0 = arith.constant 0 : i32
    return %arg0, %c0_i32 : i32, i32
  }
  func.func @transform_1(%arg0: i32) -> (i32, i32) {
    %c0_i32 = arith.constant 0 : i32
    %c0_i32_0 = arith.constant 0 : i32
    %c0_i32_1 = arith.constant 0 : i32
    return %c0_i32, %c0_i32_0 : i32, i32
  }
  func.func @transform_2(%arg0: i32) -> (i32, i32) {
    %c0_i32 = arith.constant 0 : i32
    %c0_i32_0 = arith.constant 0 : i32
    return %arg0, %c0_i32 : i32, i32
  }
  func.func @transform_3(%arg0: i32) -> (i32, i32) {
    %c0_i32 = arith.constant 0 : i32
    %c0_i32_0 = arith.constant 0 : i32
    return %arg0, %c0_i32 : i32, i32
  }
}

</mosaic_0001>

<bundles_post_ra>
// kernel: noise_trigger.1
= control target key start
LH: loop header
LB: loop body
LE: loop exit
PB: predicated region body
PF: predicated region fallthrough
CT: control target
= control target key end

     0   :  { %v198_v0 = vmov 0   ;;  %v18_v3 = vlaneseq  ;;  %v199_v5 = vmov 1983009808   ;;  %s238_s2 = inlined_call_operand.vmem [shape: s32[2,1], index: 2, kind: input, shape index: {}]   ;;  %s239_s1 = inlined_call_operand.vmem [shape: f32[1,768], index: 1, kind: input, shape index: {}]   ;;  %s240_s0 = inlined_call_operand.vmem [shape: f32[2,768], index: 0, kind: input, shape index: {}, may-alias: {0,3}]   ;;  %s241_s3 = inlined_call_operand.vmem [shape: f32[2,768], index: 3, kind: output, shape index: {}, may-alias: {0,3}]  }
   0x1   :  { %196 = vset.pattern.permute.xlu0 %v198_v0  ;;  %v75_v1 = vld [vmem:[%s238_s2] sm:$0x3]  ;;  %v45_v6 = vunpack.c.l.s4 %v199_v5  ;;  %v15_v31 = vld [vmem:[%s240_s0 + $0x8] sm:$0xf] }
   0x2   :  { %vm76_vm0 = vcmp.ne.s32.totalorder %v75_v1, 0  ;;  %v19_v4 = vshrl.u32 %v18_v3, 7  ;;  %v16_v11 = vld [vmem:[%s239_s1] sm:$0x3f] }
   0x3   :  { %v77_v2 = vsel %vm76_vm0, 1, %v198_v0  ;;  %v46_v12 = vunpack.c.0.s8 %v45_v6  ;;  %v14_v27 = vld [vmem:[%s240_s0] sm:$0xff] }
   0x4   :  { %79 = vperm.xlu0 %196, %v77_v2   ;;  %v20_v7 = vsub.s32 0, %v19_v4  ;;  %v24_v8 = vsub.s32 1, %v19_v4  ;;  %v28_v9 = vsub.s32 2, %v19_v4  ;;  %v32_v10 = vsub.s32 3, %v19_v4 }
   0x5   :  { %v49_v17 = vsub.s32 %v46_v12, %v19_v4  ;;  %v36_v20 = vsub.s32 4, %v19_v4  ;;  %v40_v21 = vsub.s32 5, %v19_v4  ;;  %v117_v37 = vcombine.high %v14_v27, %v14_v27 }
   0x6   :  { %v21_v13 = vrot.slane %v16_v11, %v20_v7  ;;  %v25_v14 = vrot.slane %v16_v11, %v24_v8  ;;  %v29_v15 = vrot.slane %v16_v11, %v28_v9  ;;  %v33_v16 = vrot.slane %v16_v11, %v32_v10 }
   0x7   :  { %v37_v24 = vrot.slane %v16_v11, %v36_v20  ;;  %v41_v25 = vrot.slane %v16_v11, %v40_v21  ;;  %v124_v41 = vrot.slane %v14_v27, %v49_v17  ;;  %v131_v42 = vrot.slane %v117_v37, %v49_v17 }
   0x8   :  { %v42_v18 = vcombine.low %v21_v13, %v25_v14  ;;  %v43_v19 = vcombine.low %v29_v15, %v33_v16  ;;  %v140_v44 = vrot.slane %v15_v31, %v49_v17 }
   0x9   :  { %v59_v28 = vcombine.low %v37_v24, %v41_v25  ;;  %v132_v47 = vcombine.high %v124_v41, %v124_v41  ;;  %v133_v48 = vcombine.high %v131_v42, %v131_v42 }
   0xa   :  { %v50_v22 = vrot.slane %v42_v18, %v49_v17  ;;  %v57_v23 = vrot.slane %v43_v19, %v49_v17  ;;  %v141_v50 = vcombine.high %v140_v44, %v140_v44 }
   0xb   :  { %v66_v30 = vrot.slane %v59_v28, %v49_v17 }
   0xc   :  { %v58_v26 = vcombine.low %v50_v22, %v57_v23 }
   0xd   :  { %v70_v33 = vadd.f32 %v66_v30, %v15_v31 }
   0xe   :  { %v69_v29 = vadd.f32 %v58_v26, %v14_v27 }
   0xf   :  { %v72_v35 = vmax.f32 %v70_v33, 0.0 }
  0x10   :  { %v71_v32 = vmax.f32 %v69_v29, 0.0 }
  0x11   :  { %v74_v38 = vmin.f32 %v72_v35, 1.0 }
  0x12   :  { %v73_v34 = vmin.f32 %v71_v32, 1.0 }
  0x13   :  { %v107_v43 = vrot.slane %v74_v38, %v49_v17 }
  0x14   :  { %v84_v36 = vcombine.high %v73_v34, %v73_v34  ;;  %v91_v39 = vrot.slane %v73_v34, %v49_v17 }
  0x15   :  { %v108_v49 = vcombine.high %v107_v43, %v107_v43 }
  0x16   :  { %v98_v40 = vrot.slane %v84_v36, %v49_v17  ;;  %v99_v45 = vcombine.high %v91_v39, %v91_v39 }
  0x18   :  { %v100_v46 = vcombine.high %v98_v40, %v98_v40 }
  0x83   :  { %v80_v51 = vpop.permute.xlu0 %79 }
  0x84   :  { %vm81_vm1 = vcmp.eq.s32.totalorder %v80_v51, 1 }
  0x85   :  { %v148_v52 = vsel %vm81_vm1, %v91_v39, %v124_v41  ;;  %v149_v53 = vsel %vm81_vm1, %v99_v45, %v132_v47  ;;  %v150_v54 = vsel %vm81_vm1, %v98_v40, %v131_v42  ;;  %v151_v55 = vsel %vm81_vm1, %v100_v46, %v133_v48 }
  0x86   :  { %v152_v56 = vsel %vm81_vm1, %v107_v43, %v140_v44  ;;  %v153_v57 = vsel %vm81_vm1, %v108_v49, %v141_v50  ;;  %v160_v58 = vcombine.low %v148_v52, %v149_v53  ;;  %v161_v59 = vcombine.low %v150_v54, %v151_v55 }
  0x87   :  { %v177_v60 = vcombine.low %v152_v56, %v153_v57 }
  0x88   :  { %v168_v61 = vrot.slane %v160_v58, %v49_v17  ;;  %v175_v62 = vrot.slane %v161_v59, %v49_v17 }
  0x89   :  { %193 = vst.sshfl [vmem:[%s241_s3 + $0x8] sm:$0x33 pattern:$0x76325410] %v177_v60 }
  0x8a   :  { %v176_v63 = vcombine.low %v168_v61, %v175_v62 }
  0x8c   :  { %187 = vst [vmem:[%s241_s3] sm:$0xff] %v176_v63 }

</bundles_post_ra>
